<compile_context>
chip_gen: v7x
topology: tpu7x:2x2x1
jax: 0.10.0
libtpu: 0.0.40
codegen_flags: <defaults>
</compile_context>

<pallas_src>
import functools

import jax
import jax.numpy as jnp
from jax.experimental import pallas as pl
from jax.experimental.pallas import tpu as pltpu

_TB_MAX = 8192                      # batch-tile (lanes per grid step)
_VMEM_LIMIT_BYTES = 32 * 1024 * 1024  # safe scoped-VMEM budget on v5e/v6e/v7x


def _round_up(x, m):
    return -(-x // m) * m


def _resolve_tanh_dtype(tanh_dtype, compute_dtype):
    """bf16 tanh only where the EUP supports it (v6e/v7x); f32 otherwise."""
    if tanh_dtype is not None:
        return tanh_dtype
    if jnp.dtype(compute_dtype) == jnp.dtype(jnp.float32):
        return jnp.float32
    kind = jax.devices()[0].device_kind.lower()
    has_bf16_eup = ("v6" in kind) or ("v7" in kind)
    return jnp.bfloat16 if has_bf16_eup else jnp.float32


# ----------------------------------------------------------------------------
# Kernel (transposed: batch on lanes)
# ----------------------------------------------------------------------------
def _mlp_kernel(x_ref, w1_ref, b1_ref, w2_ref, b2_ref, w3_ref, b3_ref, o_ref,
                *, apply_sigmoid, tanh_dtype):
    cd = w2_ref.dtype  # MXU compute dtype (bf16 by default)

    # Layer 1 (fused concat): (H1, IN) @ (IN, TB) -> (H1, TB), f32 accumulation.
    z1 = jnp.dot(w1_ref[...], x_ref[...].astype(cd),
                 preferred_element_type=jnp.float32) + b1_ref[...]
    h1 = jnp.tanh(z1.astype(tanh_dtype))

    # Layer 2: (H2, H1) @ (H1, TB) -> (H2, TB).
    z2 = jnp.dot(w2_ref[...], h1.astype(cd),
                 preferred_element_type=jnp.float32) + b2_ref[...]
    h2 = jnp.tanh(z2.astype(tanh_dtype))

    # Head: (1, H2) @ (H2, TB) -> lane-dense (1, TB); b3 is an SMEM scalar.
    logits = jnp.dot(w3_ref[...], h2.astype(cd),
                     preferred_element_type=jnp.float32) + b3_ref[0, 0]

    if apply_sigmoid:  # fused HYPODiscrim.d head (one extra EUP op)
        logits = 1.0 / (1.0 + jnp.exp(-logits))

    o_ref[...] = logits


# ----------------------------------------------------------------------------
# Wrapper
# ----------------------------------------------------------------------------
@functools.partial(jax.jit, static_argnames=("apply_sigmoid", "tanh_dtype"))
def _forward_impl(states, actions, log_pis, prepped, apply_sigmoid, tanh_dtype):
    w1t, b1t, w2t, b2t, w3t, b3 = prepped
    B = states.shape[0]
    IN = states.shape[1] + actions.shape[1] + log_pis.shape[1]
    H1 = w1t.shape[0]
    H2 = w2t.shape[0]
    cd = w2t.dtype

    # Batch tiling on the lane dim (multiple of 128).  Target >= 2 grid steps
    # when the batch allows so v7x shards across both TensorCores; the extra
    # step is noise on single-TC chips.
    B128 = _round_up(B, 128)
    TB = min(_TB_MAX, max(128, _round_up(pl.cdiv(B128, 2), 128)))
    B_pad = _round_up(B, TB)
    grid = (B_pad // TB,)

    # Fused concat + transpose (+ compute-dtype cast + zero pad of the ragged
    # final tile): one small XLA relayout; batch lands on the lane dimension so
    # every kernel block is lane-dense.
    x_t = jnp.concatenate([states, actions, log_pis], axis=-1).T.astype(cd)
    if B_pad != B:
        x_t = jnp.pad(x_t, ((0, 0), (0, B_pad - B)))

    out = pl.pallas_call(
        functools.partial(_mlp_kernel, apply_sigmoid=apply_sigmoid,
                          tanh_dtype=tanh_dtype),
        out_shape=jax.ShapeDtypeStruct((1, B_pad), jnp.float32),
        grid=grid,
        in_specs=[
            # Batch-tiled transposed input.
            pl.BlockSpec((IN, TB), lambda i: (0, i)),
            # Transposed weights / biases: resident across the whole grid.
            pl.BlockSpec((H1, IN), lambda i: (0, 0)),   # W1^T
            pl.BlockSpec((H1, 1), lambda i: (0, 0)),    # b1^T
            pl.BlockSpec((H2, H1), lambda i: (0, 0)),   # W2^T
            pl.BlockSpec((H2, 1), lambda i: (0, 0)),    # b2^T
            pl.BlockSpec((1, H2), lambda i: (0, 0)),    # W3^T
            # b3: single scalar in SMEM (no padded VMEM tile / DMA).
            pl.BlockSpec(memory_space=pltpu.MemorySpace.SMEM),
        ],
        out_specs=pl.BlockSpec((1, TB), lambda i: (0, i)),  # lane-dense output
        compiler_params=pltpu.CompilerParams(
            dimension_semantics=("parallel",),
            vmem_limit_bytes=_VMEM_LIMIT_BYTES),
    )(x_t, w1t, b1t, w2t, b2t, w3t, b3)

    return out[0, :B][:, None]  # (B, 1)


def hypo_discrim_forward(states, actions, log_pis, prepped_params,
                         tanh_dtype=None):
    """HYPODiscrim.forward (logits)."""
    tanh_dtype = _resolve_tanh_dtype(tanh_dtype, prepped_params[2].dtype)
    return _forward_impl(states, actions, log_pis, prepped_params,
                         apply_sigmoid=False, tanh_dtype=tanh_dtype)


def hypo_discrim_d(states, actions, log_pis, prepped_params, tanh_dtype=None):
    """HYPODiscrim.d: sigmoid fused into the same kernel."""
    tanh_dtype = _resolve_tanh_dtype(tanh_dtype, prepped_params[2].dtype)
    return _forward_impl(states, actions, log_pis, prepped_params,
                         apply_sigmoid=True, tanh_dtype=tanh_dtype)


# ----------------------------------------------------------------------------
# Parameter prep (one-time): pad hidden dims to 128 lanes (explicit zeros),
# transpose everything to the batch-on-lanes layout, cast matmul operands to
# the MXU compute dtype (bf16 by default).  Biases stay f32.
# ----------------------------------------------------------------------------
def prepare_params(params, compute_dtype=jnp.bfloat16):
    w1, b1, w2, b2, w3, b3 = params
    H1, H2 = w1.shape[1], w2.shape[1]
    H1p, H2p = _round_up(H1, 128), _round_up(H2, 128)

    w1t = jnp.pad(w1, ((0, 0), (0, H1p - H1))).T.astype(compute_dtype)   # (H1p, IN)
    b1t = jnp.pad(b1, ((0, 0), (0, H1p - H1))).T.astype(jnp.float32)     # (H1p, 1)
    w2t = jnp.pad(w2, ((0, H1p - H1), (0, H2p - H2))).T.astype(compute_dtype)  # (H2p, H1p)
    b2t = jnp.pad(b2, ((0, 0), (0, H2p - H2))).T.astype(jnp.float32)     # (H2p, 1)
    w3t = jnp.pad(w3, ((0, H2p - H2), (0, 0))).T.astype(compute_dtype)   # (1, H2p)
    b3p = b3.astype(jnp.float32).reshape(1, 1)
    return (w1t, b1t, w2t, b2t, w3t, b3p)


def init_params(key, state_dim, action_dim, hidden_units=(100, 100)):
    """Deterministic init mimicking torch.nn.Linear (uniform +-1/sqrt(fan_in))."""
    in_dim = state_dim + action_dim + action_dim
    dims = [in_dim, *hidden_units, 1]
    params = []
    keys = jax.random.split(key, 2 * (len(dims) - 1))
    for i in range(len(dims) - 1):
        fan_in, fan_out = dims[i], dims[i + 1]
        bound = 1.0 / (fan_in ** 0.5)
        w = jax.random.uniform(keys[2 * i], (fan_in, fan_out), jnp.float32,
                               -bound, bound)
        b = jax.random.uniform(keys[2 * i + 1], (1, fan_out), jnp.float32,
                               -bound, bound)
        params.extend([w, b])
    return tuple(params)


# ----------------------------------------------------------------------------
# Pure-JAX references (correctness checks only)
# ----------------------------------------------------------------------------
def _reference_forward_f32(states, actions, log_pis, params):
    x = jnp.concatenate([states, actions, log_pis], axis=-1).astype(jnp.float32)
    w1, b1, w2, b2, w3, b3 = params
    h = jnp.tanh(x @ w1 + b1)
    h = jnp.tanh(h @ w2 + b2)
    return h @ w3 + b3


def _reference_forward_matched(states, actions, log_pis, params,
                               compute_dtype, tanh_dtype):
    """Same dtype recipe as the kernel: cd matmul inputs, f32 accum/bias,
    tanh in tanh_dtype."""
    cd = compute_dtype
    x = jnp.concatenate([states, actions, log_pis], axis=-1).astype(cd)
    w1, b1, w2, b2, w3, b3 = params
    z1 = jnp.dot(x, w1.astype(cd), preferred_element_type=jnp.float32) + b1
    h1 = jnp.tanh(z1.astype(tanh_dtype))
    z2 = jnp.dot(h1.astype(cd), w2.astype(cd),
                 preferred_element_type=jnp.float32) + b2
    h2 = jnp.tanh(z2.astype(tanh_dtype))
    return jnp.dot(h2.astype(cd), w3.astype(cd),
                   preferred_element_type=jnp.float32) + b3


if __name__ == "__main__":
    key = jax.random.PRNGKey(0)
    k_params, k_s, k_a, k_lp = jax.random.split(key, 4)

    # Small shapes consistent with the module: batch=8, state_dim=8, action_dim=4.
    B, state_dim, action_dim = 8, 8, 4
    params = init_params(k_params, state_dim, action_dim, hidden_units=(100, 100))

    states = jax.random.normal(k_s, (B, state_dim), jnp.float32)
    actions = jax.random.normal(k_a, (B, action_dim), jnp.float32)
    log_pis = -jnp.abs(jax.random.normal(k_lp, (B, action_dim), jnp.float32))

    # --- 1) f32 matmul + f32 tanh: strict check against the pure-f32 reference.
    prepped_f32 = prepare_params(params, jnp.float32)
    out_f32 = jax.block_until_ready(
        hypo_discrim_forward(states, actions, log_pis, prepped_f32))
    ref_f32 = _reference_forward_f32(states, actions, log_pis, params)
    assert out_f32.shape == (B, 1), out_f32.shape
    assert jnp.allclose(out_f32, ref_f32, atol=1e-4, rtol=1e-4), (out_f32, ref_f32)

    # --- 2) bf16 matmul, forced f32 tanh: tight check vs matched reference.
    prepped = prepare_params(params, jnp.bfloat16)
    out_bf16_f32tanh = jax.block_until_ready(
        hypo_discrim_forward(states, actions, log_pis, prepped,
                             tanh_dtype=jnp.float32))
    ref_matched_f32tanh = _reference_forward_matched(
        states, actions, log_pis, params, jnp.bfloat16, jnp.float32)
    assert jnp.allclose(out_bf16_f32tanh, ref_matched_f32tanh,
                        atol=2e-3, rtol=2e-3)

    # --- 3) Default deployment config (bf16 matmul, device-gated tanh dtype).
    auto_tanh = _resolve_tanh_dtype(None, jnp.bfloat16)
    out = jax.block_until_ready(
        hypo_discrim_forward(states, actions, log_pis, prepped))
    ref_matched = _reference_forward_matched(
        states, actions, log_pis, params, jnp.bfloat16, auto_tanh)
    assert jnp.allclose(out, ref_matched, atol=5e-2, rtol=5e-2)
    assert jnp.allclose(out, ref_f32, atol=1e-1, rtol=1e-1)

    # --- 4) d() head with fused sigmoid.
    d = jax.block_until_ready(hypo_discrim_d(states, actions, log_pis, prepped))
    assert d.shape == (B, 1)
    assert jnp.all((d >= 0.0) & (d <= 1.0))
    assert jnp.allclose(d, jax.nn.sigmoid(ref_matched), atol=5e-2, rtol=5e-2)

    # --- 5) Multi-tile grid path (B not a multiple of 128 -> ragged tile padded
    #         inside the fused relayout; 2 grid steps exercise the pipeline).
    Bb = 2500
    kb0, kb1, kb2 = jax.random.split(jax.random.PRNGKey(1), 3)
    s_b = jax.random.normal(kb0, (Bb, state_dim), jnp.float32)
    a_b = jax.random.normal(kb1, (Bb, action_dim), jnp.float32)
    lp_b = -jnp.abs(jax.random.normal(kb2, (Bb, action_dim), jnp.float32))
    out_b = jax.block_until_ready(
        hypo_discrim_forward(s_b, a_b, lp_b, prepped, tanh_dtype=jnp.float32))
    ref_b = _reference_forward_matched(s_b, a_b, lp_b, params,
                                       jnp.bfloat16, jnp.float32)
    assert out_b.shape == (Bb, 1)
    assert jnp.allclose(out_b, ref_b, atol=5e-3, rtol=5e-3)

    print("KERNEL_OK")
</pallas_src>

<mosaic_0001>
module attributes {stable_mosaic.version = 11 : i64} {
  func.func @_mlp_kernel(%arg0: i32, %arg1: memref<16x128xf32, #tpu.memory_space<vmem>>, %arg2: memref<128x16xf32, #tpu.memory_space<vmem>>, %arg3: memref<128x1xf32, #tpu.memory_space<vmem>>, %arg4: memref<128x128xf32, #tpu.memory_space<vmem>>, %arg5: memref<128x1xf32, #tpu.memory_space<vmem>>, %arg6: memref<1x128xf32, #tpu.memory_space<vmem>>, %arg7: memref<1x1xf32, #tpu.memory_space<smem>>, %arg8: memref<1x128xf32, #tpu.memory_space<vmem>>) attributes {dimension_semantics = [#tpu.dimension_semantics<parallel>], iteration_bounds = array<i64: 1>, scalar_prefetch = 0 : i64, scratch_operands = 0 : i64, tpu.core_type = #tpu.core_type<tc>, window_params = [{transform_indices = @transform_0, window_bounds = array<i64: 16, 128>}, {pipeline_mode = #tpu.pipeline_mode<synchronous>, transform_indices = @transform_1, window_bounds = array<i64: 128, 16>}, {pipeline_mode = #tpu.pipeline_mode<synchronous>, transform_indices = @transform_2, window_bounds = array<i64: 128, 1>}, {pipeline_mode = #tpu.pipeline_mode<synchronous>, transform_indices = @transform_3, window_bounds = array<i64: 128, 128>}, {pipeline_mode = #tpu.pipeline_mode<synchronous>, transform_indices = @transform_4, window_bounds = array<i64: 128, 1>}, {pipeline_mode = #tpu.pipeline_mode<synchronous>, transform_indices = @transform_5, window_bounds = array<i64: 1, 128>}, {transform_indices = @transform_6, window_bounds = array<i64: 1, 1>}, {transform_indices = @transform_7, window_bounds = array<i64: 1, 128>}]} {
    %c0 = arith.constant 0 : index
    %c0_0 = arith.constant 0 : index
    %0 = vector.load %arg2[%c0, %c0_0] : memref<128x16xf32, #tpu.memory_space<vmem>>, vector<128x16xf32>
    %c0_1 = arith.constant 0 : index
    %c0_2 = arith.constant 0 : index
    %1 = vector.load %arg1[%c0_1, %c0_2] : memref<16x128xf32, #tpu.memory_space<vmem>>, vector<16x128xf32>
    %cst = arith.constant dense<0.000000e+00> : vector<128x128xf32>
    %2 = tpu.matmul %0, %1, %cst {dimension_numbers = #tpu.dot_dimension_numbers<[1], [0], [0], [1], [0, 0, 1, 1], [], []>} : vector<128x16xf32>, vector<16x128xf32>, vector<128x128xf32> -> vector<128x128xf32>
    %c0_3 = arith.constant 0 : index
    %c0_4 = arith.constant 0 : index
    %3 = vector.load %arg3[%c0_3, %c0_4] : memref<128x1xf32, #tpu.memory_space<vmem>>, vector<128x1xf32>
    %4 = vector.broadcast %3 : vector<128x1xf32> to vector<128x128xf32>
    %5 = arith.addf %2, %4 : vector<128x128xf32>
    %6 = math.tanh %5 : vector<128x128xf32>
    %c0_5 = arith.constant 0 : index
    %c0_6 = arith.constant 0 : index
    %7 = vector.load %arg4[%c0_5, %c0_6] : memref<128x128xf32, #tpu.memory_space<vmem>>, vector<128x128xf32>
    %cst_7 = arith.constant dense<0.000000e+00> : vector<128x128xf32>
    %8 = tpu.matmul %7, %6, %cst_7 {dimension_numbers = #tpu.dot_dimension_numbers<[1], [0], [0], [1], [0, 0, 1, 1], [], []>} : vector<128x128xf32>, vector<128x128xf32>, vector<128x128xf32> -> vector<128x128xf32>
    %c0_8 = arith.constant 0 : index
    %c0_9 = arith.constant 0 : index
    %9 = vector.load %arg5[%c0_8, %c0_9] : memref<128x1xf32, #tpu.memory_space<vmem>>, vector<128x1xf32>
    %10 = vector.broadcast %9 : vector<128x1xf32> to vector<128x128xf32>
    %11 = arith.addf %8, %10 : vector<128x128xf32>
    %12 = math.tanh %11 : vector<128x128xf32>
    %c0_10 = arith.constant 0 : index
    %c0_11 = arith.constant 0 : index
    %13 = vector.load %arg6[%c0_10, %c0_11] : memref<1x128xf32, #tpu.memory_space<vmem>>, vector<1x128xf32>
    %cst_12 = arith.constant dense<0.000000e+00> : vector<1x128xf32>
    %14 = tpu.matmul %13, %12, %cst_12 {dimension_numbers = #tpu.dot_dimension_numbers<[1], [0], [0], [1], [0, 0, 1, 1], [], []>} : vector<1x128xf32>, vector<128x128xf32>, vector<1x128xf32> -> vector<1x128xf32>
    %c0_13 = arith.constant 0 : index
    %c0_14 = arith.constant 0 : index
    %15 = memref.load %arg7[%c0_13, %c0_14] : memref<1x1xf32, #tpu.memory_space<smem>>
    %16 = vector.broadcast %15 : f32 to vector<1x128xf32>
    %17 = arith.addf %14, %16 : vector<1x128xf32>
    %c0_15 = arith.constant 0 : index
    %c0_16 = arith.constant 0 : index
    %18 = vector.load %arg8[%c0_15, %c0_16] : memref<1x128xf32, #tpu.memory_space<vmem>>, vector<1x128xf32>
    tpu.vector_store %arg8[%c0_15, %c0_16], %17 {strides = array<i32>} : memref<1x128xf32, #tpu.memory_space<vmem>>, vector<1x128xf32>,
    return
  }
  func.func @transform_0(%arg0: i32) -> (i32, i32) {
    %c0_i32 = arith.constant 0 : i32
    %c0_i32_0 = arith.constant 0 : i32
    return %c0_i32, %arg0 : i32, i32
  }
  func.func @transform_1(%arg0: i32) -> (i32, i32) {
    %c0_i32 = arith.constant 0 : i32
    %c0_i32_0 = arith.constant 0 : i32
    %c0_i32_1 = arith.constant 0 : i32
    return %c0_i32, %c0_i32_0 : i32, i32
  }
  func.func @transform_2(%arg0: i32) -> (i32, i32) {
    %c0_i32 = arith.constant 0 : i32
    %c0_i32_0 = arith.constant 0 : i32
    %c0_i32_1 = arith.constant 0 : i32
    return %c0_i32, %c0_i32_0 : i32, i32
  }
  func.func @transform_3(%arg0: i32) -> (i32, i32) {
    %c0_i32 = arith.constant 0 : i32
    %c0_i32_0 = arith.constant 0 : i32
    %c0_i32_1 = arith.constant 0 : i32
    return %c0_i32, %c0_i32_0 : i32, i32
  }
  func.func @transform_4(%arg0: i32) -> (i32, i32) {
    %c0_i32 = arith.constant 0 : i32
    %c0_i32_0 = arith.constant 0 : i32
    %c0_i32_1 = arith.constant 0 : i32
    return %c0_i32, %c0_i32_0 : i32, i32
  }
  func.func @transform_5(%arg0: i32) -> (i32, i32) {
    %c0_i32 = arith.constant 0 : i32
    %c0_i32_0 = arith.constant 0 : i32
    %c0_i32_1 = arith.constant 0 : i32
    return %c0_i32, %c0_i32_0 : i32, i32
  }
  func.func @transform_6(%arg0: i32) -> (i32, i32) {
    %c0_i32 = arith.constant 0 : i32
    %c0_i32_0 = arith.constant 0 : i32
    %c0_i32_1 = arith.constant 0 : i32
    return %c0_i32, %c0_i32_0 : i32, i32
  }
  func.func @transform_7(%arg0: i32) -> (i32, i32) {
    %c0_i32 = arith.constant 0 : i32
    %c0_i32_0 = arith.constant 0 : i32
    return %c0_i32, %arg0 : i32, i32
  }
}

</mosaic_0001>

<bundles_post_ra>
// kernel: _forward_impl.1
= control target key start
LH: loop header
LB: loop body
LE: loop exit
PB: predicated region body
PF: predicated region fallthrough
CT: control target
= control target key end

     0   :  { %vm141_vm0 = vcmask 130048   ;;  %v1034_v3 = vmov 0   ;;  %vm1036_vm1 = vmmov 0   ;;  %s1309_s0 = inlined_call_operand.vmem [shape: f32[16,128], index: 0, kind: input, shape index: {}]   ;;  %s1310_s1 = inlined_call_operand.vmem [shape: f32[128,16], index: 1, kind: input, shape index: {}]   ;;  %s1311_s2 = inlined_call_operand.vmem [shape: f32[128,1], index: 2, kind: input, shape index: {}]   ;;  %s1312_s4 = inlined_call_operand.vmem [shape: f32[128,1], index: 4, kind: input, shape index: {}]   ;;  %s1313_s3 = inlined_call_operand.vmem [shape: f32[128,128], index: 3, kind: input, shape index: {}]   ;;  %s1314_s5 = inlined_call_operand.vmem [shape: f32[1,128], index: 5, kind: input, shape index: {}]   ;;  %s1315_s6 = inlined_call_operand.<no memory space> [shape: f32[1,1], index: 6, kind: input, shape index: {}]   ;;  %s1316_s7 = inlined_call_operand.vmem [shape: f32[1,128], index: 7, kind: output, shape index: {}]  }
   0x1   :  { %v43_v0 = vld [vmem:[%s1309_s0] sm:$0xff]  ;;  %v44_v1 = vld [vmem:[%s1309_s0 + $0x8] sm:$0xff]  ;;  %968 = vset.pattern.permute.xlu0 %v1034_v3  ;;  %969 = vset.pattern.permute.xlu1 %v1034_v3  ;;  %v29_v7 = vld [vmem:[%s1310_s1 + $0x10] sm:$0xff] }
   0x2   :  { %v27_v2 = vld [vmem:[%s1310_s1] sm:$0xff]  ;;  %v904_v4 = vpack.c.bf16 %v44_v1, %v43_v0  ;;  %v28_v5 = vld [vmem:[%s1310_s1 + $0x8] sm:$0xff]  ;;  %v47_v8 = vld [vmem:[%s1311_s2 + $0x10] sm:$0xff] }
   0x3   :  { %789 = vmatprep.mubr.msk.f32.mxu0 %vm141_vm0, %v27_v2  ;;  %v45_v6 = vld [vmem:[%s1311_s2] sm:$0xff]  ;;  %73 = vperm.xlu1 %969, %v47_v8   ;;  %v46_v9 = vld [vmem:[%s1311_s2 + $0x8] sm:$0xff]  ;;  %v48_v10 = vld [vmem:[%s1311_s2 + $0x18] sm:$0xff] }
   0x4   :  { %905 = vmatprep.subr.bf16.mxu0 %v904_v4  ;;  %63 = vperm.xlu0 %968, %v45_v6   ;;  %v30_v11 = vld [vmem:[%s1310_s1 + $0x18] sm:$0xff]  ;;  %v31_v12 = vld [vmem:[%s1310_s1 + $0x20] sm:$0xff]  ;;  %v50_v14 = vld [vmem:[%s1311_s2 + $0x28] sm:$0xff] }
   0x5   :  { %907 = vmatpush3.bf16.msra.mxu0 %v904_v4  ;;  %v49_v13 = vld [vmem:[%s1311_s2 + $0x20] sm:$0xff]  ;;  %v32_v15 = vld [vmem:[%s1310_s1 + $0x28] sm:$0xff]  ;;  %v33_v16 = vld [vmem:[%s1310_s1 + $0x30] sm:$0xff] }
   0x6   :  { %v51_v17 = vld [vmem:[%s1311_s2 + $0x30] sm:$0xff]  ;;  %v52_v18 = vld [vmem:[%s1311_s2 + $0x38] sm:$0xff]  ;;  %v35_v20 = vld [vmem:[%s1310_s1 + $0x40] sm:$0xff] }
   0x7   :  { %78 = vperm.xlu1 %969, %v48_v10   ;;  %v34_v19 = vld [vmem:[%s1310_s1 + $0x38] sm:$0xff]  ;;  %v53_v21 = vld [vmem:[%s1311_s2 + $0x40] sm:$0xff]  ;;  %v54_v22 = vld [vmem:[%s1311_s2 + $0x48] sm:$0xff] }
   0x8   :  { %790 = vmatmul.mubr.msk.f32.vlgmr.msra.gmra.mrb[0].mxu0 %vm141_vm0, %v28_v5  ;;  %68 = vperm.xlu0 %968, %v46_v9   ;;  %v36_v23 = vld [vmem:[%s1310_s1 + $0x48] sm:$0xff]  ;;  %v37_v24 = vld [vmem:[%s1310_s1 + $0x50] sm:$0xff]  ;;  %v56_v26 = vld [vmem:[%s1311_s2 + $0x58] sm:$0xff] }
   0x9   :  { %792 = vmatprep.mubr.msk.f32.mxu0 %vm141_vm0, %v29_v7  ;;  %v55_v25 = vld [vmem:[%s1311_s2 + $0x50] sm:$0xff]  ;;  %v38_v27 = vld [vmem:[%s1310_s1 + $0x58] sm:$0xff]  ;;  %v39_v28 = vld [vmem:[%s1310_s1 + $0x60] sm:$0xff] }
   0xa   :  { %v57_v29 = vld [vmem:[%s1311_s2 + $0x60] sm:$0xff]  ;;  %v58_v30 = vld [vmem:[%s1311_s2 + $0x68] sm:$0xff]  ;;  %v41_v32 = vld [vmem:[%s1310_s1 + $0x70] sm:$0xff] }
   0xb   :  { %88 = vperm.xlu1 %969, %v50_v14   ;;  %v40_v31 = vld [vmem:[%s1310_s1 + $0x68] sm:$0xff]  ;;  %v59_v33 = vld [vmem:[%s1311_s2 + $0x70] sm:$0xff]  ;;  %v60_v34 = vld [vmem:[%s1311_s2 + $0x78] sm:$0xff] }
   0xc   :  { %793 = vmatmul.mubr.msk.f32.gmra.mrb[2].mxu0 %vm141_vm0, %v30_v11  ;;  %83 = vperm.xlu0 %968, %v49_v13   ;;  %v42_v35 = vld [vmem:[%s1310_s1 + $0x78] sm:$0xff]  ;;  %v367_v36 = vld [vmem:[%s1312_s4] sm:$0xff]  ;;  %v368_v37 = vld [vmem:[%s1312_s4 + $0x8] sm:$0xff] }
   0xd   :  { %795 = vmatprep.mubr.msk.f32.mxu0 %vm141_vm0, %v31_v12  ;;  %v369_v38 = vld [vmem:[%s1312_s4 + $0x10] sm:$0xff]  ;;  %v370_v39 = vld [vmem:[%s1312_s4 + $0x18] sm:$0xff]  ;;  %v371_v40 = vld [vmem:[%s1312_s4 + $0x20] sm:$0xff] }
   0xe   :  { %v372_v41 = vld [vmem:[%s1312_s4 + $0x28] sm:$0xff]  ;;  %v373_v42 = vld [vmem:[%s1312_s4 + $0x30] sm:$0xff]  ;;  %v374_v43 = vld [vmem:[%s1312_s4 + $0x38] sm:$0xff] }
   0xf   :  { %98 = vperm.xlu1 %969, %v52_v18   ;;  %v375_v44 = vld [vmem:[%s1312_s4 + $0x40] sm:$0xff]  ;;  %v376_v45 = vld [vmem:[%s1312_s4 + $0x48] sm:$0xff]  ;;  %v377_v46 = vld [vmem:[%s1312_s4 + $0x50] sm:$0xff] }
  0x10   :  { %796 = vmatmul.mubr.msk.f32.gmra.mrb[4].mxu0 %vm141_vm0, %v32_v15  ;;  %93 = vperm.xlu0 %968, %v51_v17   ;;  %v378_v47 = vld [vmem:[%s1312_s4 + $0x58] sm:$0xff]  ;;  %v379_v48 = vld [vmem:[%s1312_s4 + $0x60] sm:$0xff]  ;;  %v380_v49 = vld [vmem:[%s1312_s4 + $0x68] sm:$0xff] }
  0x11   :  { %798 = vmatprep.mubr.msk.f32.mxu0 %vm141_vm0, %v33_v16  ;;  %v381_v50 = vld [vmem:[%s1312_s4 + $0x70] sm:$0xff]  ;;  %v382_v51 = vld [vmem:[%s1312_s4 + $0x78] sm:$0xff]  ;;  %v351_v52 = vld [vmem:[%s1313_s3] sm:$0xff] }
  0x12   :  { %845 = vmatprep.mubr.f32.mxu1 %v351_v52 }
  0x13   :  { %108 = vperm.xlu1 %969, %v54_v22  }
  0x14   :  { %799 = vmatmul.mubr.msk.f32.gmra.mrb[6].mxu0 %vm141_vm0, %v34_v19  ;;  %103 = vperm.xlu0 %968, %v53_v21  }
  0x15   :  { %801 = vmatprep.mubr.msk.f32.mxu0 %vm141_vm0, %v35_v20 }
  0x17   :  { %118 = vperm.xlu1 %969, %v56_v26  }
  0x18   :  { %802 = vmatmul.mubr.msk.f32.gmra.mrb[8].mxu0 %vm141_vm0, %v36_v23  ;;  %113 = vperm.xlu0 %968, %v55_v25  }
  0x19   :  { %804 = vmatprep.mubr.msk.f32.mxu0 %vm141_vm0, %v37_v24 }
  0x1b   :  { %128 = vperm.xlu1 %969, %v58_v30  }
  0x1c   :  { %805 = vmatmul.mubr.msk.f32.gmra.mrb[10].mxu0 %vm141_vm0, %v38_v27  ;;  %123 = vperm.xlu0 %968, %v57_v29  }
  0x1d   :  { %807 = vmatprep.mubr.msk.f32.mxu0 %vm141_vm0, %v39_v28 }
  0x1f   :  { %138 = vperm.xlu1 %969, %v60_v34  }
  0x20   :  { %808 = vmatmul.mubr.msk.f32.gmra.mrb[12].mxu0 %vm141_vm0, %v40_v31  ;;  %133 = vperm.xlu0 %968, %v59_v33  }
  0x21   :  { %810 = vmatprep.mubr.msk.f32.mxu0 %vm141_vm0, %v41_v32 }
  0x23   :  { %390 = vperm.xlu1 %969, %v368_v37  }
  0x24   :  { %811 = vmatmul.mubr.msk.f32.gmra.mrb[14].mxu0 %vm141_vm0, %v42_v35  ;;  %385 = vperm.xlu0 %968, %v367_v36  }
  0x27   :  { %400 = vperm.xlu1 %969, %v370_v39  }
  0x28   :  { %395 = vperm.xlu0 %968, %v369_v38  }
  0x2b   :  { %410 = vperm.xlu1 %969, %v372_v41  }
  0x2c   :  { %405 = vperm.xlu0 %968, %v371_v40  }
  0x2f   :  { %420 = vperm.xlu1 %969, %v374_v43  }
  0x30   :  { %415 = vperm.xlu0 %968, %v373_v42  }
  0x33   :  { %430 = vperm.xlu1 %969, %v376_v45  }
  0x34   :  { %425 = vperm.xlu0 %968, %v375_v44  }
  0x37   :  { %440 = vperm.xlu1 %969, %v378_v47  }
  0x38   :  { %435 = vperm.xlu0 %968, %v377_v46  }
  0x3b   :  { %450 = vperm.xlu1 %969, %v380_v49  }
  0x3c   :  { %445 = vperm.xlu0 %968, %v379_v48  }
  0x3f   :  { %460 = vperm.xlu1 %969, %v382_v51  }
  0x40   :  { %455 = vperm.xlu0 %968, %v381_v50  }
  0x82   :  { %v74_v53 = vpop.permute.xlu1 %73 }
  0x83   :  { %v64_v54 = vpop.permute.xlu0 %63 }
  0x86   :  { %v79_v55 = vpop.permute.xlu1 %78 }
  0x87   :  { %v69_v56 = vpop.permute.xlu0 %68 }
  0x8a   :  { %v89_v57 = vpop.permute.xlu1 %88 }
  0x8b   :  { %v84_v58 = vpop.permute.xlu0 %83 }
  0x8e   :  { %v99_v63 = vpop.permute.xlu1 %98 }
  0x8f   :  { %v94_v1 = vpop.permute.xlu0 %93 }
  0x92   :  { %v109_v8 = vpop.permute.xlu1 %108 }
  0x93   :  { %v104_v10 = vpop.permute.xlu0 %103 }
  0x96   :  { %v119_v18 = vpop.permute.xlu1 %118 }
  0x97   :  { %v114_v21 = vpop.permute.xlu0 %113 }
  0x9a   :  { %v129_v32 = vpop.permute.xlu1 %128 }
  0x9b   :  { %v124_v34 = vpop.permute.xlu0 %123 }
  0x9e   :  { %v139_v43 = vpop.permute.xlu1 %138 }
  0x9f   :  { %v134_v46 = vpop.permute.xlu0 %133 }
  0xdb   :  { %v791_v59 = vpop.f32.mrb[0].mxu0 }
  0xdc   :  { %v262_v60 = vadd.f32 %v791_v59, %v69_v56  ;;  %v256_v61 = vpop.f32.mrb[1].mxu0 }
  0xdd   :  { %v257_v62 = vadd.f32 %v256_v61, %v64_v54  ;;  %v352_v61 = vld [vmem:[%s1313_s3 + $0x8] sm:$0xff] }
  0xde   :  { %970 = vtanh.f32 %v262_v60 }
  0xdf   :  { %972 = vtanh.f32 %v257_v62  ;;  %v794_v0 = vpop.f32.mrb[2].mxu0  ;;  %v353_v62 = vld [vmem:[%s1313_s3 + $0x10] sm:$0xff] }
  0xe0   :  { %v272_v2 = vadd.f32 %v794_v0, %v79_v55  ;;  %v266_v3 = vpop.f32.mrb[3].mxu0  ;;  %v355_v0 = vld [vmem:[%s1313_s3 + $0x20] sm:$0xff] }
  0xe1   :  { %v267_v4 = vadd.f32 %v266_v3, %v74_v53  ;;  %v358_v3 = vld [vmem:[%s1313_s3 + $0x38] sm:$0xff] }
  0xe2   :  { %974 = vtanh.f32 %v272_v2  ;;  %v357_v2 = vld [vmem:[%s1313_s3 + $0x30] sm:$0xff] }
  0xe3   :  { %976 = vtanh.f32 %v267_v4  ;;  %v797_v5 = vpop.f32.mrb[4].mxu0  ;;  %v359_v4 = vld [vmem:[%s1313_s3 + $0x40] sm:$0xff] }
  0xe4   :  { %v282_v6 = vadd.f32 %v797_v5, %v89_v57  ;;  %v276_v7 = vpop.f32.mrb[5].mxu0  ;;  %v360_v5 = vld [vmem:[%s1313_s3 + $0x48] sm:$0xff] }
  0xe5   :  { %v277_v9 = vadd.f32 %v276_v7, %v84_v58  ;;  %v362_v7 = vld [vmem:[%s1313_s3 + $0x58] sm:$0xff] }
  0xe6   :  { %978 = vtanh.f32 %v282_v6  ;;  %v361_v6 = vld [vmem:[%s1313_s3 + $0x50] sm:$0xff] }
  0xe7   :  { %980 = vtanh.f32 %v277_v9  ;;  %v800_v11 = vpop.f32.mrb[6].mxu0  ;;  %v364_v9 = vld [vmem:[%s1313_s3 + $0x68] sm:$0xff] }
  0xe8   :  { %v971_v12 = vpop.eup %970  ;;  %v292_v13 = vadd.f32 %v800_v11, %v99_v63  ;;  %v286_v14 = vpop.f32.mrb[7].mxu0  ;;  %v354_v63 = vld [vmem:[%s1313_s3 + $0x18] sm:$0xff] }
  0xe9   :  { %v973_v15 = vpop.eup %972  ;;  %v287_v16 = vadd.f32 %v286_v14, %v94_v1  ;;  %v356_v1 = vld [vmem:[%s1313_s3 + $0x28] sm:$0xff]  ;;  %v366_v11 = vld [vmem:[%s1313_s3 + $0x78] sm:$0xff]  ;;  %v391_v14 = vpop.permute.xlu1 %390 }
  0xea   :  { %982 = vtanh.f32 %v292_v13  ;;  %v908_v17 = vpack.c.bf16 %v971_v12, %v973_v15  ;;  %v1035_v12 = vmov 0.0|0.0   ;;  %v1037_v13 = vmov 0.0   ;;  %v386_v15 = vpop.permute.xlu0 %385 }
  0xeb   :  { %984 = vtanh.f32 %v287_v16  ;;  %v803_v19 = vpop.f32.mrb[8].mxu0  ;;  %940 = vmatprep.subr.bf16.mxu0 %v1035_v12  ;;  %901 = vmatprep.mubr.msk.f32.mxu0 %vm1036_vm1, %v1037_v13 }
  0xec   :  { %v975_v20 = vpop.eup %974  ;;  %v302_v22 = vadd.f32 %v803_v19, %v109_v8  ;;  %v296_v23 = vpop.f32.mrb[9].mxu0  ;;  %909 = vmatprep.subr.bf16.mxu1 %v908_v17  ;;  %v363_v8 = vld [vmem:[%s1313_s3 + $0x60] sm:$0xff] }
  0xed   :  { %v977_v24 = vpop.eup %976  ;;  %v297_v25 = vadd.f32 %v296_v23, %v104_v10  ;;  %911 = vmatpush3.bf16.msra.mxu1 %v908_v17  ;;  %v365_v10 = vld [vmem:[%s1313_s3 + $0x70] sm:$0xff]  ;;  %v401_v16 = vpop.permute.xlu1 %400 }
  0xee   :  { %986 = vtanh.f32 %v302_v22  ;;  %v912_v26 = vpack.c.bf16 %v975_v20, %v977_v24  ;;  %v396_v17 = vpop.permute.xlu0 %395 }
  0xef   :  { %988 = vtanh.f32 %v297_v25  ;;  %v806_v27 = vpop.f32.mrb[10].mxu0 }
  0xf0   :  { %v979_v28 = vpop.eup %978  ;;  %v312_v29 = vadd.f32 %v806_v27, %v119_v18  ;;  %v306_v30 = vpop.f32.mrb[11].mxu0  ;;  %913 = vmatprep.subr.bf16.mxu1 %v912_v26 }
  0xf1   :  { %v981_v31 = vpop.eup %980  ;;  %v307_v33 = vadd.f32 %v306_v30, %v114_v21  ;;  %915 = vmatpush3.bf16.msra.mxu1 %v912_v26  ;;  %v411_v18 = vpop.permute.xlu1 %410 }
  0xf2   :  { %990 = vtanh.f32 %v312_v29  ;;  %v916_v35 = vpack.c.bf16 %v979_v28, %v981_v31  ;;  %v406_v19 = vpop.permute.xlu0 %405 }
  0xf3   :  { %992 = vtanh.f32 %v307_v33  ;;  %v809_v36 = vpop.f32.mrb[12].mxu0 }
  0xf4   :  { %v983_v37 = vpop.eup %982  ;;  %v322_v38 = vadd.f32 %v809_v36, %v129_v32  ;;  %v316_v39 = vpop.f32.mrb[13].mxu0  ;;  %917 = vmatprep.subr.bf16.mxu1 %v916_v35 }
  0xf5   :  { %v985_v40 = vpop.eup %984  ;;  %v317_v41 = vadd.f32 %v316_v39, %v124_v34  ;;  %919 = vmatpush3.bf16.msra.mxu1 %v916_v35  ;;  %v421_v24 = vpop.permute.xlu1 %420 }
  0xf6   :  { %994 = vtanh.f32 %v322_v38  ;;  %v920_v42 = vpack.c.bf16 %v983_v37, %v985_v40  ;;  %v416_v26 = vpop.permute.xlu0 %415 }
  0xf7   :  { %996 = vtanh.f32 %v317_v41  ;;  %v812_v44 = vpop.f32.mrb[14].mxu0 }
  0xf8   :  { %v987_v45 = vpop.eup %986  ;;  %v332_v47 = vadd.f32 %v812_v44, %v139_v43  ;;  %v326_v48 = vpop.f32.mrb[15].mxu0  ;;  %921 = vmatprep.subr.bf16.mxu1 %v920_v42 }
  0xf9   :  { %v989_v49 = vpop.eup %988  ;;  %v327_v50 = vadd.f32 %v326_v48, %v134_v46  ;;  %923 = vmatpush3.bf16.msra.mxu1 %v920_v42  ;;  %v431_v33 = vpop.permute.xlu1 %430 }
  0xfa   :  { %998 = vtanh.f32 %v332_v47  ;;  %v924_v51 = vpack.c.bf16 %v987_v45, %v989_v49  ;;  %v426_v35 = vpop.permute.xlu0 %425 }
  0xfb   :  { %1000 = vtanh.f32 %v327_v50 }
  0xfc   :  { %v991_v52 = vpop.eup %990  ;;  %925 = vmatprep.subr.bf16.mxu1 %v924_v51 }
  0xfd   :  { %v993_v53 = vpop.eup %992  ;;  %927 = vmatpush3.bf16.msra.mxu1 %v924_v51  ;;  %v441_v43 = vpop.permute.xlu1 %440 }
  0xfe   :  { %v928_v54 = vpack.c.bf16 %v991_v52, %v993_v53  ;;  %v436_v46 = vpop.permute.xlu0 %435 }
 0x100   :  { %v995_v55 = vpop.eup %994  ;;  %929 = vmatprep.subr.bf16.mxu1 %v928_v54 }
 0x101   :  { %v997_v56 = vpop.eup %996  ;;  %931 = vmatpush3.bf16.msra.mxu1 %v928_v54 }
 0x102   :  { %v932_v57 = vpack.c.bf16 %v995_v55, %v997_v56 }
 0x104   :  { %v999_v58 = vpop.eup %998  ;;  %933 = vmatprep.subr.bf16.mxu1 %v932_v57 }
 0x105   :  { %v1001_v59 = vpop.eup %1000  ;;  %935 = vmatpush3.bf16.msra.mxu1 %v932_v57  ;;  %v451_v57 = vpop.permute.xlu1 %450 }
 0x106   :  { %v936_v60 = vpack.c.bf16 %v999_v58, %v1001_v59  ;;  %v446_v59 = vpop.permute.xlu0 %445 }
 0x108   :  { %937 = vmatprep.subr.bf16.mxu1 %v936_v60 }
 0x109   :  { %939 = vmatpush3.bf16.msra.mxu1 %v936_v60 }
 0x10c   :  { %846 = vmatmul.mubr.f32.vlgmr.msra.gmra.mrb[0].mxu1 %v352_v61 }
 0x10d   :  { %848 = vmatprep.mubr.f32.mxu1 %v353_v62 }
 0x110   :  { %849 = vmatmul.mubr.f32.gmra.mrb[2].mxu1 %v354_v63 }
 0x111   :  { %851 = vmatprep.mubr.f32.mxu1 %v355_v0 }
 0x114   :  { %852 = vmatmul.mubr.f32.gmra.mrb[4].mxu1 %v356_v1 }
 0x115   :  { %854 = vmatprep.mubr.f32.mxu1 %v357_v2 }
 0x118   :  { %855 = vmatmul.mubr.f32.gmra.mrb[6].mxu1 %v358_v3 }
 0x119   :  { %857 = vmatprep.mubr.f32.mxu1 %v359_v4  ;;  %v461_v4 = vpop.permute.xlu1 %460 }
 0x11c   :  { %858 = vmatmul.mubr.f32.gmra.mrb[8].mxu1 %v360_v5 }
 0x11d   :  { %860 = vmatprep.mubr.f32.mxu1 %v361_v6 }
 0x120   :  { %861 = vmatmul.mubr.f32.gmra.mrb[10].mxu1 %v362_v7  ;;  %v456_v7 = vpop.permute.xlu0 %455 }
 0x121   :  { %863 = vmatprep.mubr.f32.mxu1 %v363_v8 }
 0x124   :  { %864 = vmatmul.mubr.f32.gmra.mrb[12].mxu1 %v364_v9 }
 0x125   :  { %866 = vmatprep.mubr.f32.mxu1 %v365_v10 }
 0x128   :  { %867 = vmatmul.mubr.f32.gmra.mrb[14].mxu1 %v366_v11 }
 0x1df   :  { %v847_v20 = vpop.f32.mrb[0].mxu1 }
 0x1e0   :  { %v535_v21 = vadd.f32 %v847_v20, %v391_v14  ;;  %v529_v22 = vpop.f32.mrb[1].mxu1 }
 0x1e1   :  { %v530_v23 = vadd.f32 %v529_v22, %v386_v15 }
 0x1e2   :  { %1002 = vtanh.f32 %v535_v21 }
 0x1e3   :  { %1004 = vtanh.f32 %v530_v23  ;;  %v850_v25 = vpop.f32.mrb[2].mxu1  ;;  %v624_v23 = vld [vmem:[%s1314_s5] sm:$0x1] }
 0x1e4   :  { %v545_v27 = vadd.f32 %v850_v25, %v401_v16  ;;  %v539_v28 = vpop.f32.mrb[3].mxu1 }
 0x1e5   :  { %v540_v29 = vadd.f32 %v539_v28, %v396_v17 }
 0x1e6   :  { %1006 = vtanh.f32 %v545_v27 }
 0x1e7   :  { %1008 = vtanh.f32 %v540_v29  ;;  %v853_v30 = vpop.f32.mrb[4].mxu1 }
 0x1e8   :  { %v555_v31 = vadd.f32 %v853_v30, %v411_v18  ;;  %v549_v32 = vpop.f32.mrb[5].mxu1 }
 0x1e9   :  { %v550_v34 = vadd.f32 %v549_v32, %v406_v19 }
 0x1ea   :  { %1010 = vtanh.f32 %v555_v31 }
 0x1eb   :  { %1012 = vtanh.f32 %v550_v34  ;;  %v856_v36 = vpop.f32.mrb[6].mxu1 }
 0x1ec   :  { %v1003_v37 = vpop.eup %1002  ;;  %v565_v38 = vadd.f32 %v856_v36, %v421_v24  ;;  %v559_v39 = vpop.f32.mrb[7].mxu1  ;;  %v626_v24 = vstv %s1315_s6 }
 0x1ed   :  { %v1005_v40 = vpop.eup %1004  ;;  %v560_v41 = vadd.f32 %v559_v39, %v416_v26 }
 0x1ee   :  { %1014 = vtanh.f32 %v565_v38  ;;  %v941_v42 = vpack.c.bf16 %v1003_v37, %v1005_v40 }
 0x1ef   :  { %1016 = vtanh.f32 %v560_v41  ;;  %v859_v44 = vpop.f32.mrb[8].mxu1 }
 0x1f0   :  { %v1007_v45 = vpop.eup %1006  ;;  %v575_v47 = vadd.f32 %v859_v44, %v431_v33  ;;  %v569_v48 = vpop.f32.mrb[9].mxu1  ;;  %942 = vmatpush3.bf16.msra.mxu0 %v941_v42 }
 0x1f1   :  { %v1009_v49 = vpop.eup %1008  ;;  %v570_v50 = vadd.f32 %v569_v48, %v426_v35  ;;  %943 = vmatprep.subr.bf16.mxu0 %v1035_v12 }
 0x1f2   :  { %1018 = vtanh.f32 %v575_v47  ;;  %v944_v51 = vpack.c.bf16 %v1007_v45, %v1009_v49 }
 0x1f3   :  { %1020 = vtanh.f32 %v570_v50  ;;  %v862_v52 = vpop.f32.mrb[10].mxu1 }
 0x1f4   :  { %v1011_v53 = vpop.eup %1010  ;;  %v585_v54 = vadd.f32 %v862_v52, %v441_v43  ;;  %v579_v55 = vpop.f32.mrb[11].mxu1  ;;  %945 = vmatpush3.bf16.msra.mxu0 %v944_v51 }
 0x1f5   :  { %v1013_v56 = vpop.eup %1012  ;;  %v580_v58 = vadd.f32 %v579_v55, %v436_v46  ;;  %946 = vmatprep.subr.bf16.mxu0 %v1035_v12 }
 0x1f6   :  { %1022 = vtanh.f32 %v585_v54  ;;  %v947_v60 = vpack.c.bf16 %v1011_v53, %v1013_v56 }
 0x1f7   :  { %1024 = vtanh.f32 %v580_v58  ;;  %v865_v61 = vpop.f32.mrb[12].mxu1 }
 0x1f8   :  { %v1015_v62 = vpop.eup %1014  ;;  %v595_v63 = vadd.f32 %v865_v61, %v451_v57  ;;  %v589_v0 = vpop.f32.mrb[13].mxu1  ;;  %948 = vmatpush3.bf16.msra.mxu0 %v947_v60 }
 0x1f9   :  { %v1017_v1 = vpop.eup %1016  ;;  %v590_v2 = vadd.f32 %v589_v0, %v446_v59  ;;  %949 = vmatprep.subr.bf16.mxu0 %v1035_v12 }
 0x1fa   :  { %1026 = vtanh.f32 %v595_v63  ;;  %v950_v3 = vpack.c.bf16 %v1015_v62, %v1017_v1 }
 0x1fb   :  { %1028 = vtanh.f32 %v590_v2  ;;  %v868_v5 = vpop.f32.mrb[14].mxu1 }
 0x1fc   :  { %v1019_v6 = vpop.eup %1018  ;;  %v605_v8 = vadd.f32 %v868_v5, %v461_v4  ;;  %v599_v9 = vpop.f32.mrb[15].mxu1  ;;  %951 = vmatpush3.bf16.msra.mxu0 %v950_v3 }
 0x1fd   :  { %v1021_v10 = vpop.eup %1020  ;;  %v600_v11 = vadd.f32 %v599_v9, %v456_v7  ;;  %952 = vmatprep.subr.bf16.mxu0 %v1035_v12 }
 0x1fe   :  { %1030 = vtanh.f32 %v605_v8  ;;  %v953_v13 = vpack.c.bf16 %v1019_v6, %v1021_v10 }
 0x1ff   :  { %1032 = vtanh.f32 %v600_v11 }
 0x200   :  { %v1023_v14 = vpop.eup %1022  ;;  %954 = vmatpush3.bf16.msra.mxu0 %v953_v13 }
 0x201   :  { %v1025_v15 = vpop.eup %1024  ;;  %955 = vmatprep.subr.bf16.mxu0 %v1035_v12 }
 0x202   :  { %v956_v16 = vpack.c.bf16 %v1023_v14, %v1025_v15 }
 0x204   :  { %v1027_v17 = vpop.eup %1026  ;;  %957 = vmatpush3.bf16.msra.mxu0 %v956_v16 }
 0x205   :  { %v1029_v18 = vpop.eup %1028  ;;  %958 = vmatprep.subr.bf16.mxu0 %v1035_v12 }
 0x206   :  { %v959_v19 = vpack.c.bf16 %v1027_v17, %v1029_v18 }
 0x208   :  { %v1031_v20 = vpop.eup %1030  ;;  %960 = vmatpush3.bf16.msra.mxu0 %v959_v19 }
 0x209   :  { %v1033_v21 = vpop.eup %1032  ;;  %961 = vmatprep.subr.bf16.mxu0 %v1035_v12 }
 0x20a   :  { %v962_v22 = vpack.c.bf16 %v1031_v20, %v1033_v21 }
 0x20c   :  { %963 = vmatpush3.bf16.msra.mxu0 %v962_v22 }
 0x20f   :  { %902 = vmatmul.mubr.f32.vlgmr.msra.gmra.mrb[16].mxu0 %v624_v23 }
 0x2e2   :  { %v693_v25 = vpop.f32.mrb[16].mxu0 }
 0x2e3   :  { %v694_v26 = vadd.f32 %v693_v25, %v626_v24  ;;  %v903_v27 = vpop.f32.mrb[17].mxu0 }
 0x2e5   :  { %697 = vst [vmem:[%s1316_s7] sm:$0x1] %v694_v26 }

</bundles_post_ra>
